<compile_context>
chip_gen: v6e
topology: v6e:2x2x1
jax: 0.10.0
libtpu: 0.0.40
codegen_flags: <defaults>
</compile_context>

<pallas_src>
import functools

import jax
import jax.numpy as jnp
from jax import lax
from jax.experimental import pallas as pl
from jax.experimental.pallas import tpu as pltpu


def _residual_block_kernel(x_ref, w1_ref, b1_ref, w2_ref, b2_ref, w3_ref, b3_ref,
                           out_ref, xwin_ref, h1win_ref,
                           *, TT, K, dil, pad, apply_relu2, use_conv3, cdtype):
    """One (batch, time-tile) grid step.

    x_ref     : (1, Cin, TT)        input tile, time on lanes
    w1_ref    : (F, K*Cin)          conv1 weights, taps fused into contraction
    b1_ref    : (F, 1)
    w2_ref    : (Cout, K*F)
    b2_ref    : (Cout, 1)
    w3_ref    : (Cout, Cin)         1x1 residual projection (may be unused)
    b3_ref    : (Cout, 1)
    out_ref   : (1, Cout, TT)
    xwin_ref  : (Cin, pad+TT)       scratch: causal window of x   (carries halo)
    h1win_ref : (F,   pad+TT)       scratch: causal window of h1  (carries halo)
    """
    ti = pl.program_id(1)

    if pad > 0:
        # Causal zero left-padding: only at the first time-tile of each batch
        # element (the halo region is otherwise carried from the previous tile).
        @pl.when(ti == 0)
        def _init():
            xwin_ref[:, pl.ds(0, pad)] = jnp.zeros(
                (xwin_ref.shape[0], pad), xwin_ref.dtype)
            h1win_ref[:, pl.ds(0, pad)] = jnp.zeros(
                (h1win_ref.shape[0], pad), h1win_ref.dtype)

    x_tile = x_ref[0, :, :]                                   # (Cin, TT)
    xwin_ref[:, pl.ds(pad, TT)] = x_tile.astype(xwin_ref.dtype)

    # ---- conv1 (dilated, causal) + ReLU: one matmul with depth K*Cin -------
    xstack = jnp.concatenate(
        [xwin_ref[:, pl.ds(j * dil, TT)] for j in range(K)], axis=0)  # (K*Cin, TT)
    acc1 = jnp.dot(w1_ref[...], xstack.astype(cdtype),
                   preferred_element_type=jnp.float32)                # (F, TT)
    acc1 = acc1 + b1_ref[...]
    h1 = jnp.maximum(acc1, 0.0)            # ReLU; dropout == identity (eval)
    h1win_ref[:, pl.ds(pad, TT)] = h1.astype(h1win_ref.dtype)

    # ---- conv2 (dilated, causal): one matmul with depth K*F ----------------
    hstack = jnp.concatenate(
        [h1win_ref[:, pl.ds(j * dil, TT)] for j in range(K)], axis=0)  # (K*F, TT)
    acc2 = jnp.dot(w2_ref[...], hstack.astype(cdtype),
                   preferred_element_type=jnp.float32)                 # (Cout, TT)
    acc2 = acc2 + b2_ref[...]
    if apply_relu2:
        acc2 = jnp.maximum(acc2, 0.0)      # ReLU; dropout == identity (eval)

    # ---- residual path ------------------------------------------------------
    if use_conv3:
        res = jnp.dot(w3_ref[...], x_tile.astype(cdtype),
                      preferred_element_type=jnp.float32)
        res = res + b3_ref[...]
    else:
        res = x_tile.astype(jnp.float32)

    out_ref[0, :, :] = (acc2 + res).astype(out_ref.dtype)

    # ---- carry the causal halo (last `pad` time steps) to the next tile ----
    if pad > 0:
        xwin_ref[:, pl.ds(0, pad)] = xwin_ref[:, pl.ds(TT, pad)]
        h1win_ref[:, pl.ds(0, pad)] = h1win_ref[:, pl.ds(TT, pad)]


def _pick_time_tile(T):
    if T <= 1024:
        return T
    for tt in (1024, 512, 256, 128):
        if T % tt == 0:
            return tt
    return T


def residual_block_pallas(x, params, *, kernel_size, dilation_base,
                          nr_blocks_below, num_layers,
                          compute_dtype=None, time_tile=None):
    """x: (B, Cin, T) PyTorch NCL layout. Returns (B, Cout, T)."""
    w1, b1, w2, b2, w3, b3 = params          # PyTorch conv weights: (out, in, k)
    B, Cin, T = x.shape
    F = w1.shape[0]
    Cout = w2.shape[0]
    K = kernel_size
    dil = dilation_base ** nr_blocks_below
    pad = dil * (K - 1)
    apply_relu2 = nr_blocks_below < num_layers - 1
    use_conv3 = Cin != Cout
    cdtype = jnp.dtype(compute_dtype) if compute_dtype is not None else x.dtype

    TT = time_tile if time_tile is not None else _pick_time_tile(T)
    assert T % TT == 0, "time_tile must divide T"
    nt = T // TT

    # One-time repack of the tiny weight tensors: fuse the (tap, in-channel)
    # axes so each conv is a single deep-contraction matmul on the MXU.
    W1 = jnp.transpose(w1, (0, 2, 1)).reshape(F, K * Cin).astype(cdtype)
    W2 = jnp.transpose(w2, (0, 2, 1)).reshape(Cout, K * F).astype(cdtype)
    W3 = w3.reshape(Cout, -1).astype(cdtype)                 # (Cout, Cin)
    B1 = b1.reshape(F, 1).astype(jnp.float32)
    B2 = b2.reshape(Cout, 1).astype(jnp.float32)
    B3 = b3.reshape(Cout, 1).astype(jnp.float32)

    kern = functools.partial(
        _residual_block_kernel, TT=TT, K=K, dil=dil, pad=pad,
        apply_relu2=apply_relu2, use_conv3=use_conv3, cdtype=cdtype)

    in_specs = [
        pl.BlockSpec((1, Cin, TT), lambda b, t: (b, 0, t)),      # x tile
        pl.BlockSpec((F, K * Cin), lambda b, t: (0, 0)),         # W1 (resident)
        pl.BlockSpec((F, 1), lambda b, t: (0, 0)),               # b1
        pl.BlockSpec((Cout, K * F), lambda b, t: (0, 0)),        # W2
        pl.BlockSpec((Cout, 1), lambda b, t: (0, 0)),            # b2
        pl.BlockSpec((Cout, Cin), lambda b, t: (0, 0)),          # W3
        pl.BlockSpec((Cout, 1), lambda b, t: (0, 0)),            # b3
    ]
    out_specs = pl.BlockSpec((1, Cout, TT), lambda b, t: (b, 0, t))
    scratch_shapes = [
        pltpu.VMEM((Cin, pad + TT), cdtype),    # x causal window (halo carry)
        pltpu.VMEM((F, pad + TT), cdtype),      # conv1 activation window
    ]

    # Advisory cost estimate for XLA scheduling.
    flops = 2 * B * T * (K * Cin * F + K * F * Cout
                         + (Cin * Cout if use_conv3 else 0))
    itemsize = jnp.dtype(x.dtype).itemsize
    w_bytes = ((W1.size + W2.size + W3.size) * jnp.dtype(cdtype).itemsize
               + (F + 2 * Cout) * 4)
    bytes_accessed = (B * Cin * T + B * Cout * T) * itemsize + w_bytes
    cost = pl.CostEstimate(flops=flops, transcendentals=0,
                           bytes_accessed=bytes_accessed)

    # Explicit VMEM budget: double-buffered tiles + weights + scratch + slack,
    # clamped to a value safe on v7x's 64 MiB VMEM.
    tile_bytes = (Cin + Cout) * TT * itemsize
    scratch_bytes = (Cin + F) * (pad + TT) * jnp.dtype(cdtype).itemsize
    vmem_budget = 4 * tile_bytes + 2 * w_bytes + scratch_bytes + (4 << 20)
    vmem_budget = int(min(max(vmem_budget, 8 << 20), 48 << 20))

    out = pl.pallas_call(
        kern,
        out_shape=jax.ShapeDtypeStruct((B, Cout, T), x.dtype),
        grid_spec=pltpu.PrefetchScalarGridSpec(
            num_scalar_prefetch=0,
            grid=(B, nt),
            in_specs=in_specs,
            out_specs=out_specs,
            scratch_shapes=scratch_shapes),
        compiler_params=pltpu.CompilerParams(
            dimension_semantics=("parallel", "arbitrary"),
            vmem_limit_bytes=vmem_budget),
        cost_estimate=cost,
    )(x, W1, B1, W2, B2, W3, B3)
    return out


# ----------------------- pure-JAX reference (for checking) ------------------
def residual_block_ref(x, params, *, kernel_size, dilation_base,
                       nr_blocks_below, num_layers):
    w1, b1, w2, b2, w3, b3 = params
    dil = dilation_base ** nr_blocks_below
    pad = dil * (kernel_size - 1)

    def conv1d(z, w, b, d, p):
        y = lax.conv_general_dilated(z, w, window_strides=(1,),
                                     padding=[(p, 0)], rhs_dilation=(d,),
                                     dimension_numbers=('NCH', 'OIH', 'NCH'))
        return y + b[None, :, None]

    h = jax.nn.relu(conv1d(x, w1, b1, dil, pad))
    y = conv1d(h, w2, b2, dil, pad)
    if nr_blocks_below < num_layers - 1:
        y = jax.nn.relu(y)
    res = x
    if w1.shape[1] != w2.shape[0]:
        res = conv1d(x, w3, b3, 1, 0)
    return y + res


def make_params(key, in_ch, num_filters, out_ch, kernel_size):
    ks = jax.random.split(key, 6)
    w1 = 0.01 * jax.random.normal(ks[0], (num_filters, in_ch, kernel_size), jnp.float32)
    b1 = 0.01 * jax.random.normal(ks[1], (num_filters,), jnp.float32)
    w2 = 0.01 * jax.random.normal(ks[2], (out_ch, num_filters, kernel_size), jnp.float32)
    b2 = 0.01 * jax.random.normal(ks[3], (out_ch,), jnp.float32)
    w3 = 0.01 * jax.random.normal(ks[4], (out_ch, in_ch, 1), jnp.float32)
    b3 = 0.01 * jax.random.normal(ks[5], (out_ch,), jnp.float32)
    return (w1, b1, w2, b2, w3, b3)


if __name__ == "__main__":
    key = jax.random.PRNGKey(0)
    kx, kpA, kpB, kpC = jax.random.split(key, 4)

    num_filters, kernel_size, dilation_base = 8, 3, 2

    # Config A: last block (nr_blocks_below == num_layers-1): dilation=4,
    # conv3 residual projection used (Cin != Cout), no ReLU after conv2.
    B, T = 2, 16
    num_layers_A, nr_below_A = 3, 2
    in_A, out_A = num_filters, 4
    xA = jax.random.normal(kx, (B, in_A, T), jnp.float32)
    pA = make_params(kpA, in_A, num_filters, out_A, kernel_size)
    cfgA = dict(kernel_size=kernel_size, dilation_base=dilation_base,
                nr_blocks_below=nr_below_A, num_layers=num_layers_A)
    outA = jax.block_until_ready(residual_block_pallas(xA, pA, **cfgA))
    refA = residual_block_ref(xA, pA, **cfgA)
    assert outA.shape == (B, out_A, T)
    assert jnp.allclose(outA, refA, atol=1e-5, rtol=1e-5)

    # Config B: middle block: dilation=2, identity residual, ReLU after conv2.
    num_layers_B, nr_below_B = 3, 1
    in_B, out_B = num_filters, num_filters
    xB = jax.random.normal(jax.random.fold_in(kx, 1), (B, in_B, T), jnp.float32)
    pB = make_params(kpB, in_B, num_filters, out_B, kernel_size)
    cfgB = dict(kernel_size=kernel_size, dilation_base=dilation_base,
                nr_blocks_below=nr_below_B, num_layers=num_layers_B)
    outB = jax.block_until_ready(residual_block_pallas(xB, pB, **cfgB))
    refB = residual_block_ref(xB, pB, **cfgB)
    assert outB.shape == (B, out_B, T)
    assert jnp.allclose(outB, refB, atol=1e-5, rtol=1e-5)

    # Config C: longer sequence with multiple time tiles — exercises the
    # causal-halo carry across grid steps and lane-dense (128-wide) stores.
    B_C, T_C = 2, 256
    in_C, out_C = num_filters, num_filters
    xC = jax.random.normal(jax.random.fold_in(kx, 2), (B_C, in_C, T_C), jnp.float32)
    pC = make_params(kpC, in_C, num_filters, out_C, kernel_size)
    cfgC = dict(kernel_size=kernel_size, dilation_base=dilation_base,
                nr_blocks_below=1, num_layers=3)
    outC = jax.block_until_ready(
        residual_block_pallas(xC, pC, time_tile=128, **cfgC))
    refC = residual_block_ref(xC, pC, **cfgC)
    assert outC.shape == (B_C, out_C, T_C)
    assert jnp.allclose(outC, refC, atol=1e-5, rtol=1e-5)

    # bf16 compute path (MXU operands + scratch in bf16, f32 accumulation).
    outA_bf16 = jax.block_until_ready(
        residual_block_pallas(xA, pA, compute_dtype=jnp.bfloat16, **cfgA))
    assert jnp.allclose(outA_bf16, refA, atol=1e-2, rtol=1e-2)

    print("KERNEL_OK")
</pallas_src>

<mosaic_0001>
module attributes {stable_mosaic.version = 11 : i64} {
  func.func @_residual_block_kernel(%arg0: i32, %arg1: i32, %arg2: memref<1x8x16xf32, #tpu.memory_space<vmem>>, %arg3: memref<8x24xf32, #tpu.memory_space<vmem>>, %arg4: memref<8x1xf32, #tpu.memory_space<vmem>>, %arg5: memref<4x24xf32, #tpu.memory_space<vmem>>, %arg6: memref<4x1xf32, #tpu.memory_space<vmem>>, %arg7: memref<4x8xf32, #tpu.memory_space<vmem>>, %arg8: memref<4x1xf32, #tpu.memory_space<vmem>>, %arg9: memref<1x4x16xf32, #tpu.memory_space<vmem>>, %arg10: memref<8x24xf32, #tpu.memory_space<vmem>>, %arg11: memref<8x24xf32, #tpu.memory_space<vmem>>) attributes {dimension_semantics = [#tpu.dimension_semantics<parallel>, #tpu.dimension_semantics<arbitrary>], iteration_bounds = array<i64: 2, 1>, scalar_prefetch = 0 : i64, scratch_operands = 2 : i64, tpu.core_type = #tpu.core_type<tc>, window_params = [{transform_indices = @transform_0, window_bounds = array<i64: 1, 8, 16>}, {pipeline_mode = #tpu.pipeline_mode<synchronous>, transform_indices = @transform_1, window_bounds = array<i64: 8, 24>}, {pipeline_mode = #tpu.pipeline_mode<synchronous>, transform_indices = @transform_2, window_bounds = array<i64: 8, 1>}, {pipeline_mode = #tpu.pipeline_mode<synchronous>, transform_indices = @transform_3, window_bounds = array<i64: 4, 24>}, {pipeline_mode = #tpu.pipeline_mode<synchronous>, transform_indices = @transform_4, window_bounds = array<i64: 4, 1>}, {pipeline_mode = #tpu.pipeline_mode<synchronous>, transform_indices = @transform_5, window_bounds = array<i64: 4, 8>}, {pipeline_mode = #tpu.pipeline_mode<synchronous>, transform_indices = @transform_6, window_bounds = array<i64: 4, 1>}, {transform_indices = @transform_7, window_bounds = array<i64: 1, 4, 16>}]} {
    %c0_i32 = arith.constant 0 : i32
    %0 = arith.cmpi eq, %arg1, %c0_i32 : i32
    %1 = arith.extui %0 : i1 to i32
    %c0_i32_0 = arith.constant 0 : i32
    %2 = arith.cmpi ne, %1, %c0_i32_0 : i32
    scf.if %2 {
      %cst_42 = arith.constant 0.000000e+00 : f32
      %40 = vector.broadcast %cst_42 : f32 to vector<8x8xf32>
      %c0_43 = arith.constant 0 : index
      %c0_44 = arith.constant 0 : index
      %41 = vector.load %arg10[%c0_43, %c0_44] : memref<8x24xf32, #tpu.memory_space<vmem>>, vector<8x8xf32>
      tpu.vector_store %arg10[%c0_43, %c0_44], %40 {strides = array<i32>} : memref<8x24xf32, #tpu.memory_space<vmem>>, vector<8x8xf32>,
      %cst_45 = arith.constant 0.000000e+00 : f32
      %42 = vector.broadcast %cst_45 : f32 to vector<8x8xf32>
      %c0_46 = arith.constant 0 : index
      %c0_47 = arith.constant 0 : index
      %43 = vector.load %arg11[%c0_46, %c0_47] : memref<8x24xf32, #tpu.memory_space<vmem>>, vector<8x8xf32>
      tpu.vector_store %arg11[%c0_46, %c0_47], %42 {strides = array<i32>} : memref<8x24xf32, #tpu.memory_space<vmem>>, vector<8x8xf32>,
    } else {
    }
    %c0 = arith.constant 0 : index
    %c0_1 = arith.constant 0 : index
    %c0_2 = arith.constant 0 : index
    %3 = vector.load %arg2[%c0, %c0_1, %c0_2] : memref<1x8x16xf32, #tpu.memory_space<vmem>>, vector<1x8x16xf32>
    %4 = vector.shape_cast %3 : vector<1x8x16xf32> to vector<8x16xf32>
    %c0_3 = arith.constant 0 : index
    %c8 = arith.constant 8 : index
    %5 = vector.load %arg10[%c0_3, %c8] : memref<8x24xf32, #tpu.memory_space<vmem>>, vector<8x16xf32>
    tpu.vector_store %arg10[%c0_3, %c8], %4 {strides = array<i32>} : memref<8x24xf32, #tpu.memory_space<vmem>>, vector<8x16xf32>,
    %c0_4 = arith.constant 0 : index
    %c0_5 = arith.constant 0 : index
    %6 = vector.load %arg10[%c0_4, %c0_5] : memref<8x24xf32, #tpu.memory_space<vmem>>, vector<8x16xf32>
    %c0_6 = arith.constant 0 : index
    %c4 = arith.constant 4 : index
    %7 = vector.load %arg10[%c0_6, %c4] : memref<8x24xf32, #tpu.memory_space<vmem>>, vector<8x16xf32>
    %c0_7 = arith.constant 0 : index
    %c8_8 = arith.constant 8 : index
    %8 = vector.load %arg10[%c0_7, %c8_8] : memref<8x24xf32, #tpu.memory_space<vmem>>, vector<8x16xf32>
    %9 = tpu.concatenate %6, %7, %8 in 0 : vector<8x16xf32>, vector<8x16xf32>, vector<8x16xf32> -> vector<24x16xf32>
    %c0_9 = arith.constant 0 : index
    %c0_10 = arith.constant 0 : index
    %10 = vector.load %arg3[%c0_9, %c0_10] : memref<8x24xf32, #tpu.memory_space<vmem>>, vector<8x24xf32>
    %cst = arith.constant dense<0.000000e+00> : vector<8x16xf32>
    %11 = tpu.matmul %10, %9, %cst {dimension_numbers = #tpu.dot_dimension_numbers<[1], [0], [0], [1], [0, 0, 1, 1], [], []>} : vector<8x24xf32>, vector<24x16xf32>, vector<8x16xf32> -> vector<8x16xf32>
    %c0_11 = arith.constant 0 : index
    %c0_12 = arith.constant 0 : index
    %12 = vector.load %arg4[%c0_11, %c0_12] : memref<8x1xf32, #tpu.memory_space<vmem>>, vector<8x1xf32>
    %13 = vector.broadcast %12 : vector<8x1xf32> to vector<8x16xf32>
    %14 = arith.addf %11, %13 : vector<8x16xf32>
    %cst_13 = arith.constant 0.000000e+00 : f32
    %15 = vector.broadcast %cst_13 : f32 to vector<8x16xf32>
    %16 = arith.maximumf %14, %15 : vector<8x16xf32>
    %c0_14 = arith.constant 0 : index
    %c8_15 = arith.constant 8 : index
    %17 = vector.load %arg11[%c0_14, %c8_15] : memref<8x24xf32, #tpu.memory_space<vmem>>, vector<8x16xf32>
    tpu.vector_store %arg11[%c0_14, %c8_15], %16 {strides = array<i32>} : memref<8x24xf32, #tpu.memory_space<vmem>>, vector<8x16xf32>,
    %c0_16 = arith.constant 0 : index
    %c0_17 = arith.constant 0 : index
    %18 = vector.load %arg11[%c0_16, %c0_17] : memref<8x24xf32, #tpu.memory_space<vmem>>, vector<8x16xf32>
    %c0_18 = arith.constant 0 : index
    %c4_19 = arith.constant 4 : index
    %19 = vector.load %arg11[%c0_18, %c4_19] : memref<8x24xf32, #tpu.memory_space<vmem>>, vector<8x16xf32>
    %c0_20 = arith.constant 0 : index
    %c8_21 = arith.constant 8 : index
    %20 = vector.load %arg11[%c0_20, %c8_21] : memref<8x24xf32, #tpu.memory_space<vmem>>, vector<8x16xf32>
    %21 = tpu.concatenate %18, %19, %20 in 0 : vector<8x16xf32>, vector<8x16xf32>, vector<8x16xf32> -> vector<24x16xf32>
    %c0_22 = arith.constant 0 : index
    %c0_23 = arith.constant 0 : index
    %22 = vector.load %arg5[%c0_22, %c0_23] : memref<4x24xf32, #tpu.memory_space<vmem>>, vector<4x24xf32>
    %cst_24 = arith.constant dense<0.000000e+00> : vector<4x16xf32>
    %23 = tpu.matmul %22, %21, %cst_24 {dimension_numbers = #tpu.dot_dimension_numbers<[1], [0], [0], [1], [0, 0, 1, 1], [], []>} : vector<4x24xf32>, vector<24x16xf32>, vector<4x16xf32> -> vector<4x16xf32>
    %c0_25 = arith.constant 0 : index
    %c0_26 = arith.constant 0 : index
    %24 = vector.load %arg6[%c0_25, %c0_26] : memref<4x1xf32, #tpu.memory_space<vmem>>, vector<4x1xf32>
    %25 = vector.broadcast %24 : vector<4x1xf32> to vector<4x16xf32>
    %26 = arith.addf %23, %25 : vector<4x16xf32>
    %c0_27 = arith.constant 0 : index
    %c0_28 = arith.constant 0 : index
    %27 = vector.load %arg7[%c0_27, %c0_28] : memref<4x8xf32, #tpu.memory_space<vmem>>, vector<4x8xf32>
    %cst_29 = arith.constant dense<0.000000e+00> : vector<4x16xf32>
    %28 = tpu.matmul %27, %4, %cst_29 {dimension_numbers = #tpu.dot_dimension_numbers<[1], [0], [0], [1], [0, 0, 1, 1], [], []>} : vector<4x8xf32>, vector<8x16xf32>, vector<4x16xf32> -> vector<4x16xf32>
    %c0_30 = arith.constant 0 : index
    %c0_31 = arith.constant 0 : index
    %29 = vector.load %arg8[%c0_30, %c0_31] : memref<4x1xf32, #tpu.memory_space<vmem>>, vector<4x1xf32>
    %30 = vector.broadcast %29 : vector<4x1xf32> to vector<4x16xf32>
    %31 = arith.addf %28, %30 : vector<4x16xf32>
    %32 = arith.addf %26, %31 : vector<4x16xf32>
    %c0_32 = arith.constant 0 : index
    %c0_33 = arith.constant 0 : index
    %c0_34 = arith.constant 0 : index
    %33 = vector.load %arg9[%c0_32, %c0_33, %c0_34] : memref<1x4x16xf32, #tpu.memory_space<vmem>>, vector<1x4x16xf32>
    %34 = vector.shape_cast %33 : vector<1x4x16xf32> to vector<4x16xf32>
    %35 = vector.shape_cast %32 : vector<4x16xf32> to vector<1x4x16xf32>
    tpu.vector_store %arg9[%c0_32, %c0_33, %c0_34], %35 {strides = array<i32>} : memref<1x4x16xf32, #tpu.memory_space<vmem>>, vector<1x4x16xf32>,
    %c0_35 = arith.constant 0 : index
    %c16 = arith.constant 16 : index
    %36 = vector.load %arg10[%c0_35, %c16] : memref<8x24xf32, #tpu.memory_space<vmem>>, vector<8x8xf32>
    %c0_36 = arith.constant 0 : index
    %c0_37 = arith.constant 0 : index
    %37 = vector.load %arg10[%c0_36, %c0_37] : memref<8x24xf32, #tpu.memory_space<vmem>>, vector<8x8xf32>
    tpu.vector_store %arg10[%c0_36, %c0_37], %36 {strides = array<i32>} : memref<8x24xf32, #tpu.memory_space<vmem>>, vector<8x8xf32>,
    %c0_38 = arith.constant 0 : index
    %c16_39 = arith.constant 16 : index
    %38 = vector.load %arg11[%c0_38, %c16_39] : memref<8x24xf32, #tpu.memory_space<vmem>>, vector<8x8xf32>
    %c0_40 = arith.constant 0 : index
    %c0_41 = arith.constant 0 : index
    %39 = vector.load %arg11[%c0_40, %c0_41] : memref<8x24xf32, #tpu.memory_space<vmem>>, vector<8x8xf32>
    tpu.vector_store %arg11[%c0_40, %c0_41], %38 {strides = array<i32>} : memref<8x24xf32, #tpu.memory_space<vmem>>, vector<8x8xf32>,
    return
  }
  func.func @transform_0(%arg0: i32, %arg1: i32) -> (i32, i32, i32) {
    %c0_i32 = arith.constant 0 : i32
    %c0_i32_0 = arith.constant 0 : i32
    return %arg0, %c0_i32, %arg1 : i32, i32, i32
  }
  func.func @transform_1(%arg0: i32, %arg1: i32) -> (i32, i32) {
    %c0_i32 = arith.constant 0 : i32
    %c0_i32_0 = arith.constant 0 : i32
    %c0_i32_1 = arith.constant 0 : i32
    return %c0_i32, %c0_i32_0 : i32, i32
  }
  func.func @transform_2(%arg0: i32, %arg1: i32) -> (i32, i32) {
    %c0_i32 = arith.constant 0 : i32
    %c0_i32_0 = arith.constant 0 : i32
    %c0_i32_1 = arith.constant 0 : i32
    return %c0_i32, %c0_i32_0 : i32, i32
  }
  func.func @transform_3(%arg0: i32, %arg1: i32) -> (i32, i32) {
    %c0_i32 = arith.constant 0 : i32
    %c0_i32_0 = arith.constant 0 : i32
    %c0_i32_1 = arith.constant 0 : i32
    return %c0_i32, %c0_i32_0 : i32, i32
  }
  func.func @transform_4(%arg0: i32, %arg1: i32) -> (i32, i32) {
    %c0_i32 = arith.constant 0 : i32
    %c0_i32_0 = arith.constant 0 : i32
    %c0_i32_1 = arith.constant 0 : i32
    return %c0_i32, %c0_i32_0 : i32, i32
  }
  func.func @transform_5(%arg0: i32, %arg1: i32) -> (i32, i32) {
    %c0_i32 = arith.constant 0 : i32
    %c0_i32_0 = arith.constant 0 : i32
    %c0_i32_1 = arith.constant 0 : i32
    return %c0_i32, %c0_i32_0 : i32, i32
  }
  func.func @transform_6(%arg0: i32, %arg1: i32) -> (i32, i32) {
    %c0_i32 = arith.constant 0 : i32
    %c0_i32_0 = arith.constant 0 : i32
    %c0_i32_1 = arith.constant 0 : i32
    return %c0_i32, %c0_i32_0 : i32, i32
  }
  func.func @transform_7(%arg0: i32, %arg1: i32) -> (i32, i32, i32) {
    %c0_i32 = arith.constant 0 : i32
    %c0_i32_0 = arith.constant 0 : i32
    return %arg0, %c0_i32, %arg1 : i32, i32, i32
  }
}

</mosaic_0001>

<bundles_post_ra>
// kernel: tpu_custom_call.1
= control target key start
LH: loop header
LB: loop body
LE: loop exit
PB: predicated region body
PF: predicated region fallthrough
CT: control target
= control target key end

     0   :  { %12 = vsyncpa [#allocation5], 0  ;;  %s1145_s0 = inlined_call_operand.vmem [shape: f32[2,8,16], index: 0, kind: input, shape index: {}]   ;;  %s1146_s1 = inlined_call_operand.hbm [shape: f32[8,24], index: 1, kind: input, shape index: {}]   ;;  %s1147_s2 = inlined_call_operand.vmem [shape: f32[8,1], index: 2, kind: input, shape index: {}]   ;;  %s1148_s3 = inlined_call_operand.vmem [shape: f32[4,24], index: 3, kind: input, shape index: {}]   ;;  %s1149_s4 = inlined_call_operand.vmem [shape: f32[4,1], index: 4, kind: input, shape index: {}]   ;;  %s1150_s5 = inlined_call_operand.vmem [shape: f32[4,8], index: 5, kind: input, shape index: {}]   ;;  %s1151_s6 = inlined_call_operand.vmem [shape: f32[4,1], index: 6, kind: input, shape index: {}]   ;;  %s1152_s7 = inlined_call_operand.hbm [shape: f32[2,4,16], index: 7, kind: output, shape index: {}]  }
   0x1   :  { %13 = vsyncpa [#allocation6], 0 }
   0x2   :  { %15 = vsyncpa [#allocation6 + $0x1], 0  ;;  %s984_s24 = smov 0   ;;  %s986_s25 = smov 0  }
   0x3   :  { %s988_s26 = smov 0   ;;  %s990_s27 = smov 0  }
   0x4   :  { %s992_s28 = smov 0   ;;  %s994_s29 = smov 0  }
   0x5 LB: > { %s703_s30 = sadd.s32 4294967295, %s933_s29   ;;  %s704_s8 = sadd.s32 4294967294, %s933_s29   ;;  %s933_s29 = sphi %s994_s29, %s21_s29   ;;  %s929_s28 = sphi %s992_s28, %s1161_s28   ;;  %s925_s27 = sphi %s990_s27, %s1160_s27   ;;  %s921_s26 = sphi %s988_s26, %s1159_s26   ;;  %s917_s25 = sphi %s986_s25, %s1158_s25   ;;  %s913_s24 = sphi %s984_s24, %s1157_s24  }
   0x6   : > { %s33_s9 = sadd.s32 1, %s929_s28  ;;  %s196_s10 = sadd.s32 1, %s921_s26 }
   0x7   : > { %p35_p0 = scmp.ge.s32.totalorder %s33_s9, 2  ;;  %p206_p1 = scmp.ne.s32.totalorder %s921_s26, %s917_s25 }
   0x8   : > { %p207_p2 = scmp.eq.s32.totalorder %s703_s30, 1  ;;  %p212_p3 = scmp.ne.s32.totalorder %s917_s25, %s913_s24 }
   0x9   : > { %s1163_s9 = smov (%p35_p0, %s33_s9), 0  ;;  %p213_p5 = scmp.eq.s32.totalorder %s704_s8, 1 }
   0xa   : > { %p1024_p4 = por %p207_p2, %p206_p1  ;;  %s191_s12 = ssub.s32 %s929_s28, %s1163_s9 }
   0xb   : > { %p705_p6 = scmp.ge.s32.totalorder %s933_s29, 1  ;;  %p194_p7 = scmp.eq.s32.totalorder %s191_s12, 0 }
   0xc   : > { %p1031_p8 = por %p213_p5, %p212_p3  ;;  %p220_p9 = scmp.lt.s32.totalorder %s933_s29, 3 }
   0xd   : > { %s1037_s14 = scalar_select %p194_p7, %s921_s26, %s196_s10  }
   0xe   : > { %p1039_p10 = pnand %p705_p6, %p220_p9  ;;  %p1043_p11 = scmp.eq.s32.totalorder %s703_s30, 0 }
   0xf   : > { %s935_s17 = smov [#allocation4]  }
  0x10   : > { %p758_p12 = pneg %p1039_p10  ;;  %s233_s18 = sshll.u32 %s935_s17, 4  ;;  %s234_s18 = int_to_ptr.vmem [resolvable:$true] %s233_s18 }
  0x11   : > { %s838_s19 = scalar_lea.vmem %s234_s18, 128  ;;  %p846_p5 = scmp.lt.s32.totalorder %s234_s18, %s234_s18 }
  0x12   : > { %p759_p13 = pnand %p1043_p11, %p758_p12  ;;  %p839_p1 = scmp.ne.s32.totalorder %s234_s18, %s838_s19 }
  0x13   : > { %p847_p6 = scmp.lt.s32.totalorder %s838_s19, %s838_s19 }
  0x14   : > { %p829_p0 = pneg %p759_p13 }
  0x15   : > { %p848_p7 = por %p847_p6, %p846_p5 }
  0x16   : > { %p841_p2 = pnand %p839_p1, %p829_p0 }
  0x18   : > { %p842_p3 = pneg %p841_p2 }
  0x1a   : > { %p849_p9 = pnand %p848_p7, %p842_p3 }
  0x1c   : > { %852 = shalt.err (!%p849_p9)
}
  0x1d   : > { %761 = dma.hbm_to_vmem [thread:$0]  (!%p759_p13), %s1146_s1, 128, %s234_s18, [#allocation5]  }
  0x1e   : > { %271 = sbr.rel (%p1039_p10) target bundleno = 936 (0x3a8), region = 48 }
  0x23   : > { %904 = dma.done.wait (%p1043_p11), [#allocation5], 128  }
  0x24   : > { %906 = vsyncadd (%p1043_p11), [#allocation5], 4294967168  ;;  %p305_p12 = scmp.lt.s32.totalorder %s925_s27, 1  ;;  %vm316_vm0 = vcmask 64512   ;;  %v936_v0 = vmov 0.0   ;;  %s937_s12 = smov 8  }
  0x25   : > { %317 = vst.msk [vmem:[#allocation2] sm:$0xff] %vm316_vm0, %v936_v0  ;;  %318 = vst.msk [vmem:[#allocation3] sm:$0xff] %vm316_vm0, %v936_v0  ;;  %729 = vmatprep.subr.mxu0 %v936_v0  ;;  %738 = vmatprep.subr.mxu1 %v936_v0  ;;  %vm324_vm1 = vcmask 195648   ;;  %vm938_vm2 = vmmov 0   ;;  %v939_v3 = vmov 0   ;;  %s940_s15 = smov 124  }
  0x26   : > { %s306_s22 = scalar_select %p305_p12, %s925_s27, 1  ;;  %735 = vmatprep.mubr.msk.f32.mxu0 %vm938_vm2, %v936_v0  ;;  %744 = vmatprep.mubr.msk.f32.mxu1 %vm938_vm2, %v936_v0  ;;  %v335_v5 = vld [vmem:[%s1147_s2] sm:$0xff]  ;;  %v334_v8 = vld [vmem:[#allocation4] sm:$0xff]  ;;  %vm341_vm3 = vcmask 195584   ;;  %vm591_vm4 = vcmask 125952  }
  0x27   : > { %825 = vset.pattern.permute.xlu1 %v939_v3  ;;  %826 = vset.pattern.permute.xlu0 %v939_v3  ;;  %s941_s16 = smov 120   ;;  %v509_v14 = vld [vmem:[%s1150_s5] sm:$0xf]  ;;  %s716_s17 = sshll.u32 %s925_s27, 6 }
  0x28   : > { %s711_s23 = sshll.u32 %s306_s22, 3  ;;  %v430_v17 = vld [vmem:[%s1149_s4] sm:$0xf]  ;;  %s618_s22 = scalar_lea.hbm %s1152_s7, %s716_s17 }
  0x29   : > { %s311_s10 = scalar_lea.vmem %s1145_s0, %s711_s23  ;;  %s942_s23 = smov 112   ;;  %v510_v18 = vld [vmem:[%s1151_s6] sm:$0xf] }
  0x2a   : > { %v319_v1 = vld [vmem:[%s311_s10] sm:$0xff]  ;;  %s943_s8 = smov [#allocation7]  }
  0x2b   : > { %321 = vrot.lane.b32.xlu0 %v319_v1, %s937_s12  ;;  %v429_v21 = vld [vmem:[%s1148_s3] sm:$0xf]  ;;  %s857_s27 = sshll.u32 %s943_s8, 4  ;;  %s858_s27 = int_to_ptr.vmem [resolvable:$false] %s857_s27 }
  0x2c   : > { %s859_s10 = scalar_lea.vmem %s858_s27, 128 }
  0x9d   : > { %v322_v2 = vpop.permute.xlu0 %321 }
  0x9e   : > { %325 = vst.msk [vmem:[#allocation2] sm:$0xff] %vm324_vm1, %v322_v2 }
  0xa5   : > { %v326_v4 = vld [vmem:[#allocation2] sm:$0xff] }
  0xa6   : > { %328 = vrot.lane.b32.xlu1 %v326_v4, %s940_s15  ;;  %331 = vrot.lane.b32.xlu0 %v326_v4, %s941_s16 }
  0xaa   : > { %338 = vperm.xlu1 %825, %v335_v5  }
 0x118   : > { %v332_v6 = vpop.permute.xlu0 %331  ;;  %v329_v7 = vpop.permute.xlu1 %328 }
 0x119   : > { %730 = vmatpush3.msra.mxu0 %v332_v6 }
 0x11a   : > { %731 = vmatprep.subr.mxu0 %v936_v0 }
 0x11b   : > { %732 = vmatpush3.msra.mxu0 %v329_v7 }
 0x11c   : > { %733 = vmatprep.subr.mxu0 %v936_v0 }
 0x11d   : > { %734 = vmatpush3.msra.mxu0 %v326_v4 }
 0x11e   : > { %736 = vmatmul.mubr.msk.f32.vlgmr.msra.gmra.mxu0 %vm341_vm3, %v334_v8  ;;  %747 = vmatprep.subr.mxu0 %v936_v0 }
 0x11f   : > { %748 = vmatpush3.msra.mxu0 %v319_v1  ;;  %749 = vmatprep.mubr.msk.f32.mxu0 %vm938_vm2, %v936_v0 }
 0x122   : > { %750 = vmatmul.mubr.msk.f32.vlgmr.msra.gmra.mxu0 %vm316_vm0, %v509_v14 }
 0x125   : > { %v339_v9 = vpop.permute.xlu1 %338 }
 0x1de   : > { %v411_v10 = vpop.f32.mrf.mxu0 }
 0x1df   : > { %v412_v11 = vadd.f32 %v411_v10, %v339_v9 }
 0x1e0   : > { %v737_v12 = vpop.f32.mrf.mxu0 }
 0x1e1   : > { %v415_v13 = vmax.f32 %v412_v11, 0.0 }
 0x1e2   : > { %v586_v25 = vpop.f32.mrf.mxu0 }
 0x1e3   : > { %417 = vrot.lane.b32.xlu0 %v415_v13, %s937_s12 }
 0x1e4   : > { %v751_v26 = vpop.f32.mrf.mxu0 }
 0x255   : > { %v418_v15 = vpop.permute.xlu0 %417 }
 0x256   : > { %420 = vst.msk [vmem:[#allocation3] sm:$0xff] %vm324_vm1, %v418_v15 }
 0x25d   : > { %v421_v16 = vld [vmem:[#allocation3] sm:$0xff] }
 0x25e   : > { %423 = vrot.lane.b32.xlu0 %v421_v16, %s940_s15  ;;  %426 = vrot.lane.b32.xlu1 %v421_v16, %s941_s16  ;;  %s302_s15 = sand.u32 1, %s917_s25  }
 0x25f   : > { %s710_s16 = sshll.u32 %s302_s15, 2 }
 0x260   : > { %s304_s18 = scalar_lea.vmem [#allocation7], %s710_s16 }
 0x261   : > { %s620_s19 = sshll.u32 %s304_s18, 4  ;;  %s621_s19 = int_to_ptr.vmem [resolvable:$true] %s620_s19 }
 0x262   : > { %433 = vperm.xlu1 %825, %v430_v17   ;;  %513 = vperm.xlu0 %826, %v510_v18   ;;  %s853_s30 = scalar_lea.vmem %s621_s19, 64  ;;  %p860_p0 = scmp.lt.s32.totalorder %s621_s19, %s858_s27 }
 0x263   : > { %p854_p10 = scmp.ne.s32.totalorder %s621_s19, %s853_s30  ;;  %p861_p1 = scmp.lt.s32.totalorder %s859_s10, %s853_s30 }
 0x265   : > { %p855_p11 = pnand %p854_p10, %p1024_p4  ;;  %p862_p2 = por %p861_p1, %p860_p0 }
 0x266   : > { %595 = vrot.lane.b32.xlu1 %v326_v4, %s942_s23 }
 0x267   : > { %p856_p13 = pneg %p855_p11 }
 0x269   : > { %p863_p3 = pnand %p862_p2, %p856_p13 }
 0x26a   : > { %601 = vrot.lane.b32.xlu1 %v421_v16, %s942_s23  ;;  %s606_s23 = scalar_lea.sflag [#allocation6], %s302_s15 }
 0x2d0   : > { %v427_v19 = vpop.permute.xlu1 %426  ;;  %v424_v20 = vpop.permute.xlu0 %423 }
 0x2d1   : > { %739 = vmatpush3.msra.mxu1 %v427_v19 }
 0x2d2   : > { %740 = vmatprep.subr.mxu1 %v936_v0 }
 0x2d3   : > { %741 = vmatpush3.msra.mxu1 %v424_v20 }
 0x2d4   : > { %742 = vmatprep.subr.mxu1 %v936_v0 }
 0x2d5   : > { %743 = vmatpush3.msra.mxu1 %v421_v16 }
 0x2d6   : > { %745 = vmatmul.mubr.msk.f32.vlgmr.msra.gmra.mxu1 %vm341_vm3, %v429_v21 }
 0x2dd   : > { %v434_v22 = vpop.permute.xlu1 %433  ;;  %v514_v27 = vpop.permute.xlu0 %513 }
 0x2de   : > { %v587_v28 = vadd.f32 %v586_v25, %v514_v27 }
 0x2e1   : > { %v596_v23 = vpop.permute.xlu1 %595 }
 0x2e2   : > { %598 = vst.msk [vmem:[#allocation2] sm:$0xff] %vm316_vm0, %v596_v23 }
 0x2e5   : > { %v602_v24 = vpop.permute.xlu1 %601 }
 0x2e6   : > { %604 = vst.msk [vmem:[#allocation3] sm:$0xff] %vm316_vm0, %v602_v24 }
 0x396   : > { %v505_v29 = vpop.f32.mrf.mxu1 }
 0x397   : > { %v506_v30 = vadd.f32 %v505_v29, %v434_v22 }
 0x398   : > { %v746_v31 = vpop.f32.mrf.mxu1 }
 0x399   : > { %v590_v32 = vadd.f32 %v587_v28, %v506_v30 }
 0x39b   : > { %592 = vst.msk [vmem:[%s304_s18] sm:$0xf] %vm591_vm4, %v590_v32 }
 0x39c   : > { %866 = shalt.err (!%p863_p3)
}
 0x39d   : > { %s867_s12 = scalar_lea.hbm %s618_s22, 64  ;;  %s871_s17 = scalar_lea.hbm %s1152_s7, 128 }
 0x39e   : > { %p868_p5 = scmp.ne.s32.totalorder %s618_s22, %s867_s12  ;;  %p872_p9 = scmp.lt.s32.totalorder %s618_s22, %s1152_s7 }
 0x39f   : > { %p873_p12 = scmp.lt.s32.totalorder %s871_s17, %s867_s12 }
 0x3a0   : > { %p869_p6 = pnand %p868_p5, %p1024_p4 }
 0x3a1   : > { %p874_p10 = por %p873_p12, %p872_p9 }
 0x3a2   : > { %p870_p7 = pneg %p869_p6 }
 0x3a4   : > { %p875_p11 = pnand %p874_p10, %p870_p7 }
 0x3a6   : > { %878 = shalt.err (!%p875_p11)
}
 0x3a7   : > { %756 = dma.vmem_to_hbm [thread:$0]  (%p1024_p4), %s621_s19, 64, %s618_s22, %s606_s23  }
 0x3a8 PF: > { %p768_p13 = scmp.ge.s32.totalorder %s933_s29, 2  ;;  %s632_s21 = sand.u32 1, %s913_s24  }
 0x3a9   : > { %s633_s30 = scalar_lea.sflag [#allocation6], %s632_s21 }
 0x3aa   : > { %p763_p0 = pnand %p768_p13, %p1031_p8 }
 0x3ac   : > { %p764_p1 = pneg %p763_p0 }
 0x3ae   : > { %908 = dma.done.wait (%p764_p1), %s633_s30, 64  }
 0x3af   : > { %910 = vsyncadd (%p764_p1), %s633_s30, 4294967232  ;;  %s21_s29 = sadd.s32 1, %s933_s29   ;;  %s1157_s24 = smov %s917_s25 }
 0x3b0   : > { %p18_p2 = scmp.ge.s32.totalorder %s21_s29, 4   ;;  %s1158_s25 = smov %s921_s26 }
 0x3b1   : > { %s1159_s26 = smov %s1037_s14  ;;  %s1160_s27 = smov %s929_s28 }
 0x3b2   : > { %s1161_s28 = smov %s1163_s9  ;;  %20 = sbr.rel (!%p18_p2) target bundleno = 5 (0x5), region = 92 }
 0x3b7   :  { %638 = vsyncpa [#allocation5], 1 }
 0x3b8   :  { %640 = vsyncpa [#allocation5 + $0x1], 1 }
 0x3b9   :  { %641 = vsyncpa [#allocation6], 1 }
 0x3ba   :  { %643 = vsyncpa [#allocation6 + $0x1], 1 }

</bundles_post_ra>
